<compile_context>
chip_gen: v6e
topology: v6e:2x2x1
jax: 0.10.0
libtpu: 0.0.40
codegen_flags: <defaults>
</compile_context>

<pallas_src>
import jax
import jax.numpy as jnp
from jax import lax
from jax.experimental import pallas as pl
from jax.experimental.pallas import tpu as pltpu

SMOOTH = 1.0e-5
NUM_TASKS = 3
_NUM_STATS = 4   # tpl, tss (=tpp+tll), tpl_c, tss_c  (direct + complement pass)
SUB = 8          # sublane rows per batch element


def _round_up(x, m):
    return ((x + m - 1) // m) * m


def _has_big_vmem():
    """True on chips with ~128 MiB VMEM (v5e/v6e); conservative False otherwise."""
    try:
        return int(pltpu.get_tpu_info().vmem_capacity_bytes) >= (100 << 20)
    except Exception:  # noqa: BLE001 - any failure -> conservative (v7x-safe) defaults
        return False


def _plan_tiling(d8_valid, bytes_per_lane, max_lane_tile, target_bytes):
    """Pick (td, n_par, nd, d8_pad).

    td: lane-tile width (multiple of 128, no divisor cliff -> never collapses
    to 128 on awkward D); n_par: 2-way TensorCore split whenever there is
    enough work (guaranteed even); nd: lane steps per core; d8_pad: padded
    lane count (multiple of n_par*td, padding fraction kept small).
    """
    tgt = target_bytes // max(int(bytes_per_lane), 1)
    tgt = max(128, min(int(max_lane_tile), int(tgt)))
    tgt = max(128, (tgt // 128) * 128)

    d8_min = _round_up(d8_valid, 128)
    if d8_min <= max(128, min(tgt, 1024)):
        return d8_min, 1, 1, d8_min          # tiny problem: one tile, one core

    n_par = 2                                # even dual-TensorCore split (v7x)
    t_hi = min(tgt, _round_up(pl.cdiv(d8_valid, n_par), 128))
    best = None
    t = t_hi
    while t >= 128:
        d8_pad = _round_up(d8_valid, n_par * t)
        waste = (d8_pad - d8_valid) / d8_pad
        if best is None or waste < best[0] - 1e-12:
            best = (waste, t, d8_pad)
        if best[0] <= 1.0 / 32.0:            # <=3.1% padded work is good enough
            break
        t -= 128
    _, td, d8_pad = best
    nd = d8_pad // (n_par * td)
    return td, n_par, nd, d8_pad


def _choose_strip(td, batch):
    """Lane-strip width for the single-pass fused reduction (keeps live vregs small)."""
    s = max(128, min(512, (4096 // max(batch * SUB, 1)) // 128 * 128))
    while s > 128 and td % s != 0:
        s -= 128
    return s if td % s == 0 else 128


def _make_kernel(nd, td, strip, n_strips, unroll, d8_valid, needs_mask):
    """Accumulate per-(task, batch, sublane) Tanimoto inner products.

    Each strip of p / l is loaded once and updates all four accumulators
    (fused single pass); complement sums use (mask - p), (mask - l) directly.
    """

    def kernel(p0_ref, p1_ref, p2_ref, lab_ref, out_ref):
        d = pl.program_id(1)

        @pl.when(d == 0)
        def _init():
            out_ref[...] = jnp.zeros(out_ref.shape, out_ref.dtype)

        tile_base = (pl.program_id(0) * nd + d) * td
        batch = p0_ref.shape[0]
        preds = (p0_ref, p1_ref, p2_ref)

        for t in range(NUM_TASKS):
            p_ref = preds[t]

            def body(s, carry, _p_ref=p_ref, _t=t):
                a_pl, a_ss, a_plc, a_ssc = carry
                off = pl.multiple_of(s * strip, strip)
                p = _p_ref[:, :, pl.ds(off, strip)].astype(jnp.float32)
                l = lab_ref[:, _t, :, pl.ds(off, strip)].astype(jnp.float32)
                if needs_mask:
                    # "one" is 1.0 on valid lanes, 0.0 on lane padding, so the
                    # complement terms vanish exactly on padded lanes at the
                    # same cost as the plain (1 - p) subtraction.
                    lane = lax.broadcasted_iota(jnp.int32, (1, 1, strip), 2)
                    one = (lane + (tile_base + off) < d8_valid).astype(jnp.float32)
                else:
                    one = 1.0
                pc = one - p
                lc = one - l
                a_pl = a_pl + p * l
                a_ss = a_ss + (p * p + l * l)
                a_plc = a_plc + pc * lc
                a_ssc = a_ssc + (pc * pc + lc * lc)
                return a_pl, a_ss, a_plc, a_ssc

            zero = jnp.zeros((batch, SUB, strip), jnp.float32)
            a_pl, a_ss, a_plc, a_ssc = lax.fori_loop(
                0, n_strips, body, (zero, zero, zero, zero), unroll=unroll)

            # Tiny (B, SUB) accumulator updates; negligible next to the strip
            # loop since td is guaranteed large by the tiling planner.
            base = t * _NUM_STATS
            out_ref[0, base + 0, :, :] += jnp.sum(a_pl, axis=-1)
            out_ref[0, base + 1, :, :] += jnp.sum(a_ss, axis=-1)
            out_ref[0, base + 2, :, :] += jnp.sum(a_plc, axis=-1)
            out_ref[0, base + 3, :, :] += jnp.sum(a_ssc, axis=-1)

    return kernel


def mtsk_loss_pallas(prediction, label, n_classes=2, depth=0, max_lane_tile=65536):
    """Multi-task fractal-Tanimoto (with complement) loss averaged over 3 tasks.

    prediction: list of 3 arrays (B, n_classes, H, W); label: (B, 3*n_classes, H, W).
    """
    p0, p1, p2 = prediction
    B, C, H, W = p0.shape
    assert C == n_classes and label.shape == (B, NUM_TASKS * C, H, W)
    D = C * H * W

    # ----- plan tiling (generation-aware VMEM budget, no divisor cliffs) -----
    D8 = _round_up(D, SUB)           # fill all 8 sublanes (<=7 zero elements)
    rem = D8 - D
    d8_valid = D8 // SUB

    pred_bytes = jnp.dtype(p0.dtype).itemsize
    lab_bytes = jnp.dtype(label.dtype).itemsize
    bytes_per_lane = NUM_TASKS * B * SUB * (pred_bytes + lab_bytes)

    big_vmem = _has_big_vmem()
    target_bytes = (8 << 20) if big_vmem else (4 << 20)   # HBM bytes per grid step
    vmem_limit = (64 << 20) if big_vmem else (32 << 20)

    td, n_par, nd, d8_pad = _plan_tiling(
        d8_valid, bytes_per_lane, max_lane_tile, target_bytes)
    needs_mask = d8_pad != d8_valid
    strip = _choose_strip(td, B)
    n_strips = td // strip
    unroll = int(min(n_strips, max(1, 2048 // strip)))

    # ----- free contiguous reshapes (+ rare zero-padding) to (B[,3],SUB,d8_pad) -----
    def _prep(x, lead):
        x = x.reshape((B,) + lead + (D,))
        if rem:
            x = jnp.pad(x, [(0, 0)] * (1 + len(lead)) + [(0, rem)])
        x = x.reshape((B,) + lead + (SUB, d8_valid))
        if d8_pad != d8_valid:
            x = jnp.pad(x, [(0, 0)] * (2 + len(lead)) + [(0, d8_pad - d8_valid)])
        return x

    preds = [_prep(x, ()) for x in (p0, p1, p2)]
    lab = _prep(label, (NUM_TASKS,))

    pred_spec = pl.BlockSpec((B, SUB, td), lambda c, d: (0, 0, c * nd + d))
    lab_spec = pl.BlockSpec((B, NUM_TASKS, SUB, td), lambda c, d: (0, 0, 0, c * nd + d))
    out_spec = pl.BlockSpec((1, NUM_TASKS * _NUM_STATS, B, SUB), lambda c, d: (c, 0, 0, 0))

    kernel = _make_kernel(nd, td, strip, n_strips, unroll, d8_valid, needs_mask)

    cost = pl.CostEstimate(
        flops=14 * NUM_TASKS * B * SUB * d8_pad,
        transcendentals=0,
        bytes_accessed=NUM_TASKS * B * SUB * d8_pad * (pred_bytes + lab_bytes)
        + n_par * NUM_TASKS * _NUM_STATS * B * SUB * 4,
    )

    partial = pl.pallas_call(
        kernel,
        out_shape=jax.ShapeDtypeStruct(
            (n_par, NUM_TASKS * _NUM_STATS, B, SUB), jnp.float32),
        grid_spec=pltpu.PrefetchScalarGridSpec(
            num_scalar_prefetch=0,
            grid=(n_par, nd),
            in_specs=[pred_spec, pred_spec, pred_spec, lab_spec],
            out_specs=out_spec,
        ),
        compiler_params=pltpu.CompilerParams(
            dimension_semantics=("parallel", "arbitrary"),
            vmem_limit_bytes=vmem_limit,
        ),
        cost_estimate=cost,
    )(*preds, lab)

    # ---------------- finalize: O(3*B) scalar Tanimoto math ----------------
    sums = jnp.sum(partial, axis=(0, 3)).reshape(NUM_TASKS, _NUM_STATS, B)
    tpl = sums[:, 0, :]
    tss = sums[:, 1, :]
    # The <=7-element sublane-fill pad contributes exactly 1 (resp. 2) per
    # padded element to the complement sums; remove it here.
    tpl_c = sums[:, 2, :] - jnp.float32(rem)
    tss_c = sums[:, 3, :] - jnp.float32(2 * rem)

    if depth == 0:
        eff_depth, scale = 1, 1.0
    else:
        eff_depth, scale = depth, 1.0 / depth

    def _ratio(num_tpl, den_tss):
        num = num_tpl + SMOOTH
        den = jnp.zeros_like(num_tpl)
        for dd in range(eff_depth):
            a = 2.0 ** dd
            b = -(2.0 * a - 1.0)
            den = den + 1.0 / (a * den_tss + b * num_tpl + SMOOTH)
        return jnp.mean(num * den * scale, axis=-1)   # mean over batch -> (NUM_TASKS,)

    loss_per_task = 1.0 - 0.5 * (_ratio(tpl, tss) + _ratio(tpl_c, tss_c))
    return jnp.mean(loss_per_task)


# ---------------- pure-JAX reference (for correctness check) ----------------
def _ftnmt_ref(p, l, depth=0, smooth=1.0e-5):
    if depth == 0:
        depth, scale = 1, 1.0
    else:
        scale = 1.0 / depth

    def base(pr, lb):
        tpl = jnp.sum(pr * lb, axis=(1, 2, 3))
        tpp = jnp.sum(pr * pr, axis=(1, 2, 3))
        tll = jnp.sum(lb * lb, axis=(1, 2, 3))
        num = tpl + smooth
        denum = 0.0
        for d in range(depth):
            a = 2.0 ** d
            b = -(2.0 * a - 1.0)
            denum = denum + 1.0 / (a * (tpp + tll) + b * tpl + smooth)
        return jnp.mean(num * denum * scale)

    return 1.0 - 0.5 * (base(p, l) + base(1.0 - p, 1.0 - l))


def _mtsk_ref(prediction, label, n_classes=2):
    ls = _ftnmt_ref(prediction[0], label[:, :n_classes])
    lb = _ftnmt_ref(prediction[1], label[:, n_classes:2 * n_classes])
    ld = _ftnmt_ref(prediction[2], label[:, 2 * n_classes:])
    return (ls + lb + ld) / 3.0


if __name__ == "__main__":
    key = jax.random.PRNGKey(0)

    def make_inputs(B, NClasses, H, W, k):
        k1, k2, k3, k4 = jax.random.split(k, 4)
        prediction = [
            jax.random.uniform(k1, (B, NClasses, H, W), dtype=jnp.float32),
            jax.random.uniform(k2, (B, NClasses, H, W), dtype=jnp.float32),
            jax.random.uniform(k3, (B, NClasses, H, W), dtype=jnp.float32),
        ]
        label = (jax.random.uniform(k4, (B, 3 * NClasses, H, W),
                                    dtype=jnp.float32) > 0.5).astype(jnp.float32)
        return prediction, label

    def check(name, pred, lab, n_classes, **kw):
        out = jax.block_until_ready(
            mtsk_loss_pallas(pred, lab, n_classes=n_classes, **kw))
        ref = _mtsk_ref(pred, lab, n_classes=n_classes)
        assert jnp.allclose(out, ref, rtol=5e-5, atol=1e-5), (name, out, ref)

    k1, k2, k3 = jax.random.split(key, 3)

    # 1) small canonical shape: single tile, lane padding + in-kernel mask path.
    pred1, lab1 = make_inputs(2, 2, 16, 16, k1)
    check("small", pred1, lab1, 2)

    # 2) forced small lane tile: multi-step accumulation + even 2-way core split.
    pred2, lab2 = make_inputs(2, 2, 64, 64, k2)
    check("tiled", pred2, lab2, 2, max_lane_tile=256)

    # 3) awkward flattened size (rem>0, lane padding, dual split, strip loop, C=3).
    pred3, lab3 = make_inputs(2, 3, 65, 65, k3)
    check("awkward", pred3, lab3, 3)

    print("KERNEL_OK")
</pallas_src>

<mosaic_0001>
module attributes {stable_mosaic.version = 11 : i64} {
  func.func @kernel(%arg0: i32, %arg1: i32, %arg2: memref<2x8x128xf32, #tpu.memory_space<vmem>>, %arg3: memref<2x8x128xf32, #tpu.memory_space<vmem>>, %arg4: memref<2x8x128xf32, #tpu.memory_space<vmem>>, %arg5: memref<2x3x8x128xf32, #tpu.memory_space<vmem>>, %arg6: memref<1x12x2x8xf32, #tpu.memory_space<vmem>>) attributes {dimension_semantics = [#tpu.dimension_semantics<parallel>, #tpu.dimension_semantics<arbitrary>], iteration_bounds = array<i64: 1, 1>, scalar_prefetch = 0 : i64, scratch_operands = 0 : i64, tpu.core_type = #tpu.core_type<tc>, window_params = [{transform_indices = @transform_0, window_bounds = array<i64: 2, 8, 128>}, {transform_indices = @transform_1, window_bounds = array<i64: 2, 8, 128>}, {transform_indices = @transform_2, window_bounds = array<i64: 2, 8, 128>}, {transform_indices = @transform_3, window_bounds = array<i64: 2, 3, 8, 128>}, {transform_indices = @transform_4, window_bounds = array<i64: 1, 12, 2, 8>}]} {
    %c0_i32 = arith.constant 0 : i32
    %0 = arith.cmpi eq, %arg1, %c0_i32 : i32
    %1 = arith.extui %0 : i1 to i32
    %c0_i32_0 = arith.constant 0 : i32
    %2 = arith.cmpi ne, %1, %c0_i32_0 : i32
    scf.if %2 {
      %cst_125 = arith.constant 0.000000e+00 : f32
      %186 = vector.broadcast %cst_125 : f32 to vector<1x12x2x8xf32>
      %c0_126 = arith.constant 0 : index
      %c0_127 = arith.constant 0 : index
      %c0_128 = arith.constant 0 : index
      %c0_129 = arith.constant 0 : index
      %187 = vector.load %arg6[%c0_126, %c0_127, %c0_128, %c0_129] : memref<1x12x2x8xf32, #tpu.memory_space<vmem>>, vector<1x12x2x8xf32>
      tpu.vector_store %arg6[%c0_126, %c0_127, %c0_128, %c0_129], %186 {strides = array<i32>} : memref<1x12x2x8xf32, #tpu.memory_space<vmem>>, vector<1x12x2x8xf32>,
    } else {
    }
    %c1_i32 = arith.constant 1 : i32
    %3 = arith.muli %arg0, %c1_i32 : i32
    %4 = arith.addi %3, %arg1 : i32
    %c128_i32 = arith.constant 128 : i32
    %5 = arith.muli %4, %c128_i32 : i32
    %cst = arith.constant 0.000000e+00 : f32
    %6 = vector.broadcast %cst : f32 to vector<2x8x128xf32>
    %c0_i32_1 = arith.constant 0 : i32
    %c128_i32_2 = arith.constant 128 : i32
    %7 = arith.muli %c0_i32_1, %c128_i32_2 : i32
    %8 = tpu.assume_multiple %7, 128 : i32
    %c0 = arith.constant 0 : index
    %c0_3 = arith.constant 0 : index
    %9 = arith.index_cast %8 : i32 to index
    %10 = vector.load %arg2[%c0, %c0_3, %9] : memref<2x8x128xf32, #tpu.memory_space<vmem>>, vector<2x8x128xf32>
    %c0_4 = arith.constant 0 : index
    %c0_5 = arith.constant 0 : index
    %c0_6 = arith.constant 0 : index
    %11 = arith.index_cast %8 : i32 to index
    %12 = vector.load %arg5[%c0_4, %c0_5, %c0_6, %11] : memref<2x3x8x128xf32, #tpu.memory_space<vmem>>, vector<2x1x8x128xf32>
    %13 = vector.shape_cast %12 : vector<2x1x8x128xf32> to vector<2x8x128xf32>
    %14 = tpu.iota {dimensions = array<i32: 2>} : vector<1x1x128xi32>
    %15 = arith.addi %5, %8 : i32
    %16 = vector.broadcast %15 : i32 to vector<1x1x128xi32>
    %17 = arith.addi %14, %16 : vector<1x1x128xi32>
    %c64_i32 = arith.constant 64 : i32
    %18 = vector.broadcast %c64_i32 : i32 to vector<1x1x128xi32>
    %19 = arith.cmpi slt, %17, %18 : vector<1x1x128xi32>
    %20 = arith.extui %19 : vector<1x1x128xi1> to vector<1x1x128xi32>
    %21 = arith.sitofp %20 : vector<1x1x128xi32> to vector<1x1x128xf32>
    %22 = vector.broadcast %21 : vector<1x1x128xf32> to vector<2x8x128xf32>
    %23 = arith.subf %22, %10 : vector<2x8x128xf32>
    %24 = vector.broadcast %21 : vector<1x1x128xf32> to vector<2x8x128xf32>
    %25 = arith.subf %24, %13 : vector<2x8x128xf32>
    %26 = arith.mulf %10, %13 : vector<2x8x128xf32>
    %27 = arith.addf %6, %26 : vector<2x8x128xf32>
    %28 = arith.mulf %10, %10 : vector<2x8x128xf32>
    %29 = arith.mulf %13, %13 : vector<2x8x128xf32>
    %30 = arith.addf %28, %29 : vector<2x8x128xf32>
    %31 = arith.addf %6, %30 : vector<2x8x128xf32>
    %32 = arith.mulf %23, %25 : vector<2x8x128xf32>
    %33 = arith.addf %6, %32 : vector<2x8x128xf32>
    %34 = arith.mulf %23, %23 : vector<2x8x128xf32>
    %35 = arith.mulf %25, %25 : vector<2x8x128xf32>
    %36 = arith.addf %34, %35 : vector<2x8x128xf32>
    %37 = arith.addf %6, %36 : vector<2x8x128xf32>
    %c1_i32_7 = arith.constant 1 : i32
    %c0_8 = arith.constant 0 : index
    %c0_9 = arith.constant 0 : index
    %c0_10 = arith.constant 0 : index
    %c0_11 = arith.constant 0 : index
    %38 = vector.load %arg6[%c0_8, %c0_9, %c0_10, %c0_11] : memref<1x12x2x8xf32, #tpu.memory_space<vmem>>, vector<1x1x2x8xf32>
    %39 = vector.shape_cast %38 : vector<1x1x2x8xf32> to vector<2x8xf32>
    %cst_12 = arith.constant dense<0.000000e+00> : vector<2x8xf32>
    %40 = vector.multi_reduction <add>, %27, %cst_12 [2] : vector<2x8x128xf32> to vector<2x8xf32>
    %41 = arith.addf %39, %40 : vector<2x8xf32>
    %c0_13 = arith.constant 0 : index
    %c0_14 = arith.constant 0 : index
    %c0_15 = arith.constant 0 : index
    %c0_16 = arith.constant 0 : index
    %42 = vector.load %arg6[%c0_13, %c0_14, %c0_15, %c0_16] : memref<1x12x2x8xf32, #tpu.memory_space<vmem>>, vector<1x1x2x8xf32>
    %43 = vector.shape_cast %42 : vector<1x1x2x8xf32> to vector<2x8xf32>
    %44 = vector.shape_cast %41 : vector<2x8xf32> to vector<1x1x2x8xf32>
    tpu.vector_store %arg6[%c0_13, %c0_14, %c0_15, %c0_16], %44 {strides = array<i32>} : memref<1x12x2x8xf32, #tpu.memory_space<vmem>>, vector<1x1x2x8xf32>,
    %c0_17 = arith.constant 0 : index
    %c1 = arith.constant 1 : index
    %c0_18 = arith.constant 0 : index
    %c0_19 = arith.constant 0 : index
    %45 = vector.load %arg6[%c0_17, %c1, %c0_18, %c0_19] : memref<1x12x2x8xf32, #tpu.memory_space<vmem>>, vector<1x1x2x8xf32>
    %46 = vector.shape_cast %45 : vector<1x1x2x8xf32> to vector<2x8xf32>
    %cst_20 = arith.constant dense<0.000000e+00> : vector<2x8xf32>
    %47 = vector.multi_reduction <add>, %31, %cst_20 [2] : vector<2x8x128xf32> to vector<2x8xf32>
    %48 = arith.addf %46, %47 : vector<2x8xf32>
    %c0_21 = arith.constant 0 : index
    %c1_22 = arith.constant 1 : index
    %c0_23 = arith.constant 0 : index
    %c0_24 = arith.constant 0 : index
    %49 = vector.load %arg6[%c0_21, %c1_22, %c0_23, %c0_24] : memref<1x12x2x8xf32, #tpu.memory_space<vmem>>, vector<1x1x2x8xf32>
    %50 = vector.shape_cast %49 : vector<1x1x2x8xf32> to vector<2x8xf32>
    %51 = vector.shape_cast %48 : vector<2x8xf32> to vector<1x1x2x8xf32>
    tpu.vector_store %arg6[%c0_21, %c1_22, %c0_23, %c0_24], %51 {strides = array<i32>} : memref<1x12x2x8xf32, #tpu.memory_space<vmem>>, vector<1x1x2x8xf32>,
    %c0_25 = arith.constant 0 : index
    %c2 = arith.constant 2 : index
    %c0_26 = arith.constant 0 : index
    %c0_27 = arith.constant 0 : index
    %52 = vector.load %arg6[%c0_25, %c2, %c0_26, %c0_27] : memref<1x12x2x8xf32, #tpu.memory_space<vmem>>, vector<1x1x2x8xf32>
    %53 = vector.shape_cast %52 : vector<1x1x2x8xf32> to vector<2x8xf32>
    %cst_28 = arith.constant dense<0.000000e+00> : vector<2x8xf32>
    %54 = vector.multi_reduction <add>, %33, %cst_28 [2] : vector<2x8x128xf32> to vector<2x8xf32>
    %55 = arith.addf %53, %54 : vector<2x8xf32>
    %c0_29 = arith.constant 0 : index
    %c2_30 = arith.constant 2 : index
    %c0_31 = arith.constant 0 : index
    %c0_32 = arith.constant 0 : index
    %56 = vector.load %arg6[%c0_29, %c2_30, %c0_31, %c0_32] : memref<1x12x2x8xf32, #tpu.memory_space<vmem>>, vector<1x1x2x8xf32>
    %57 = vector.shape_cast %56 : vector<1x1x2x8xf32> to vector<2x8xf32>
    %58 = vector.shape_cast %55 : vector<2x8xf32> to vector<1x1x2x8xf32>
    tpu.vector_store %arg6[%c0_29, %c2_30, %c0_31, %c0_32], %58 {strides = array<i32>} : memref<1x12x2x8xf32, #tpu.memory_space<vmem>>, vector<1x1x2x8xf32>,
    %c0_33 = arith.constant 0 : index
    %c3 = arith.constant 3 : index
    %c0_34 = arith.constant 0 : index
    %c0_35 = arith.constant 0 : index
    %59 = vector.load %arg6[%c0_33, %c3, %c0_34, %c0_35] : memref<1x12x2x8xf32, #tpu.memory_space<vmem>>, vector<1x1x2x8xf32>
    %60 = vector.shape_cast %59 : vector<1x1x2x8xf32> to vector<2x8xf32>
    %cst_36 = arith.constant dense<0.000000e+00> : vector<2x8xf32>
    %61 = vector.multi_reduction <add>, %37, %cst_36 [2] : vector<2x8x128xf32> to vector<2x8xf32>
    %62 = arith.addf %60, %61 : vector<2x8xf32>
    %c0_37 = arith.constant 0 : index
    %c3_38 = arith.constant 3 : index
    %c0_39 = arith.constant 0 : index
    %c0_40 = arith.constant 0 : index
    %63 = vector.load %arg6[%c0_37, %c3_38, %c0_39, %c0_40] : memref<1x12x2x8xf32, #tpu.memory_space<vmem>>, vector<1x1x2x8xf32>
    %64 = vector.shape_cast %63 : vector<1x1x2x8xf32> to vector<2x8xf32>
    %65 = vector.shape_cast %62 : vector<2x8xf32> to vector<1x1x2x8xf32>
    tpu.vector_store %arg6[%c0_37, %c3_38, %c0_39, %c0_40], %65 {strides = array<i32>} : memref<1x12x2x8xf32, #tpu.memory_space<vmem>>, vector<1x1x2x8xf32>,
    %cst_41 = arith.constant 0.000000e+00 : f32
    %66 = vector.broadcast %cst_41 : f32 to vector<2x8x128xf32>
    %c0_i32_42 = arith.constant 0 : i32
    %c128_i32_43 = arith.constant 128 : i32
    %67 = arith.muli %c0_i32_42, %c128_i32_43 : i32
    %68 = tpu.assume_multiple %67, 128 : i32
    %c0_44 = arith.constant 0 : index
    %c0_45 = arith.constant 0 : index
    %69 = arith.index_cast %68 : i32 to index
    %70 = vector.load %arg3[%c0_44, %c0_45, %69] : memref<2x8x128xf32, #tpu.memory_space<vmem>>, vector<2x8x128xf32>
    %c0_46 = arith.constant 0 : index
    %c1_47 = arith.constant 1 : index
    %c0_48 = arith.constant 0 : index
    %71 = arith.index_cast %68 : i32 to index
    %72 = vector.load %arg5[%c0_46, %c1_47, %c0_48, %71] : memref<2x3x8x128xf32, #tpu.memory_space<vmem>>, vector<2x1x8x128xf32>
    %73 = vector.shape_cast %72 : vector<2x1x8x128xf32> to vector<2x8x128xf32>
    %74 = tpu.iota {dimensions = array<i32: 2>} : vector<1x1x128xi32>
    %75 = arith.addi %5, %68 : i32
    %76 = vector.broadcast %75 : i32 to vector<1x1x128xi32>
    %77 = arith.addi %74, %76 : vector<1x1x128xi32>
    %c64_i32_49 = arith.constant 64 : i32
    %78 = vector.broadcast %c64_i32_49 : i32 to vector<1x1x128xi32>
    %79 = arith.cmpi slt, %77, %78 : vector<1x1x128xi32>
    %80 = arith.extui %79 : vector<1x1x128xi1> to vector<1x1x128xi32>
    %81 = arith.sitofp %80 : vector<1x1x128xi32> to vector<1x1x128xf32>
    %82 = vector.broadcast %81 : vector<1x1x128xf32> to vector<2x8x128xf32>
    %83 = arith.subf %82, %70 : vector<2x8x128xf32>
    %84 = vector.broadcast %81 : vector<1x1x128xf32> to vector<2x8x128xf32>
    %85 = arith.subf %84, %73 : vector<2x8x128xf32>
    %86 = arith.mulf %70, %73 : vector<2x8x128xf32>
    %87 = arith.addf %66, %86 : vector<2x8x128xf32>
    %88 = arith.mulf %70, %70 : vector<2x8x128xf32>
    %89 = arith.mulf %73, %73 : vector<2x8x128xf32>
    %90 = arith.addf %88, %89 : vector<2x8x128xf32>
    %91 = arith.addf %66, %90 : vector<2x8x128xf32>
    %92 = arith.mulf %83, %85 : vector<2x8x128xf32>
    %93 = arith.addf %66, %92 : vector<2x8x128xf32>
    %94 = arith.mulf %83, %83 : vector<2x8x128xf32>
    %95 = arith.mulf %85, %85 : vector<2x8x128xf32>
    %96 = arith.addf %94, %95 : vector<2x8x128xf32>
    %97 = arith.addf %66, %96 : vector<2x8x128xf32>
    %c1_i32_50 = arith.constant 1 : i32
    %c0_51 = arith.constant 0 : index
    %c4 = arith.constant 4 : index
    %c0_52 = arith.constant 0 : index
    %c0_53 = arith.constant 0 : index
    %98 = vector.load %arg6[%c0_51, %c4, %c0_52, %c0_53] : memref<1x12x2x8xf32, #tpu.memory_space<vmem>>, vector<1x1x2x8xf32>
    %99 = vector.shape_cast %98 : vector<1x1x2x8xf32> to vector<2x8xf32>
    %cst_54 = arith.constant dense<0.000000e+00> : vector<2x8xf32>
    %100 = vector.multi_reduction <add>, %87, %cst_54 [2] : vector<2x8x128xf32> to vector<2x8xf32>
    %101 = arith.addf %99, %100 : vector<2x8xf32>
    %c0_55 = arith.constant 0 : index
    %c4_56 = arith.constant 4 : index
    %c0_57 = arith.constant 0 : index
    %c0_58 = arith.constant 0 : index
    %102 = vector.load %arg6[%c0_55, %c4_56, %c0_57, %c0_58] : memref<1x12x2x8xf32, #tpu.memory_space<vmem>>, vector<1x1x2x8xf32>
    %103 = vector.shape_cast %102 : vector<1x1x2x8xf32> to vector<2x8xf32>
    %104 = vector.shape_cast %101 : vector<2x8xf32> to vector<1x1x2x8xf32>
    tpu.vector_store %arg6[%c0_55, %c4_56, %c0_57, %c0_58], %104 {strides = array<i32>} : memref<1x12x2x8xf32, #tpu.memory_space<vmem>>, vector<1x1x2x8xf32>,
    %c0_59 = arith.constant 0 : index
    %c5 = arith.constant 5 : index
    %c0_60 = arith.constant 0 : index
    %c0_61 = arith.constant 0 : index
    %105 = vector.load %arg6[%c0_59, %c5, %c0_60, %c0_61] : memref<1x12x2x8xf32, #tpu.memory_space<vmem>>, vector<1x1x2x8xf32>
    %106 = vector.shape_cast %105 : vector<1x1x2x8xf32> to vector<2x8xf32>
    %cst_62 = arith.constant dense<0.000000e+00> : vector<2x8xf32>
    %107 = vector.multi_reduction <add>, %91, %cst_62 [2] : vector<2x8x128xf32> to vector<2x8xf32>
    %108 = arith.addf %106, %107 : vector<2x8xf32>
    %c0_63 = arith.constant 0 : index
    %c5_64 = arith.constant 5 : index
    %c0_65 = arith.constant 0 : index
    %c0_66 = arith.constant 0 : index
    %109 = vector.load %arg6[%c0_63, %c5_64, %c0_65, %c0_66] : memref<1x12x2x8xf32, #tpu.memory_space<vmem>>, vector<1x1x2x8xf32>
    %110 = vector.shape_cast %109 : vector<1x1x2x8xf32> to vector<2x8xf32>
    %111 = vector.shape_cast %108 : vector<2x8xf32> to vector<1x1x2x8xf32>
    tpu.vector_store %arg6[%c0_63, %c5_64, %c0_65, %c0_66], %111 {strides = array<i32>} : memref<1x12x2x8xf32, #tpu.memory_space<vmem>>, vector<1x1x2x8xf32>,
    %c0_67 = arith.constant 0 : index
    %c6 = arith.constant 6 : index
    %c0_68 = arith.constant 0 : index
    %c0_69 = arith.constant 0 : index
    %112 = vector.load %arg6[%c0_67, %c6, %c0_68, %c0_69] : memref<1x12x2x8xf32, #tpu.memory_space<vmem>>, vector<1x1x2x8xf32>
    %113 = vector.shape_cast %112 : vector<1x1x2x8xf32> to vector<2x8xf32>
    %cst_70 = arith.constant dense<0.000000e+00> : vector<2x8xf32>
    %114 = vector.multi_reduction <add>, %93, %cst_70 [2] : vector<2x8x128xf32> to vector<2x8xf32>
    %115 = arith.addf %113, %114 : vector<2x8xf32>
    %c0_71 = arith.constant 0 : index
    %c6_72 = arith.constant 6 : index
    %c0_73 = arith.constant 0 : index
    %c0_74 = arith.constant 0 : index
    %116 = vector.load %arg6[%c0_71, %c6_72, %c0_73, %c0_74] : memref<1x12x2x8xf32, #tpu.memory_space<vmem>>, vector<1x1x2x8xf32>
    %117 = vector.shape_cast %116 : vector<1x1x2x8xf32> to vector<2x8xf32>
    %118 = vector.shape_cast %115 : vector<2x8xf32> to vector<1x1x2x8xf32>
    tpu.vector_store %arg6[%c0_71, %c6_72, %c0_73, %c0_74], %118 {strides = array<i32>} : memref<1x12x2x8xf32, #tpu.memory_space<vmem>>, vector<1x1x2x8xf32>,
    %c0_75 = arith.constant 0 : index
    %c7 = arith.constant 7 : index
    %c0_76 = arith.constant 0 : index
    %c0_77 = arith.constant 0 : index
    %119 = vector.load %arg6[%c0_75, %c7, %c0_76, %c0_77] : memref<1x12x2x8xf32, #tpu.memory_space<vmem>>, vector<1x1x2x8xf32>
    %120 = vector.shape_cast %119 : vector<1x1x2x8xf32> to vector<2x8xf32>
    %cst_78 = arith.constant dense<0.000000e+00> : vector<2x8xf32>
    %121 = vector.multi_reduction <add>, %97, %cst_78 [2] : vector<2x8x128xf32> to vector<2x8xf32>
    %122 = arith.addf %120, %121 : vector<2x8xf32>
    %c0_79 = arith.constant 0 : index
    %c7_80 = arith.constant 7 : index
    %c0_81 = arith.constant 0 : index
    %c0_82 = arith.constant 0 : index
    %123 = vector.load %arg6[%c0_79, %c7_80, %c0_81, %c0_82] : memref<1x12x2x8xf32, #tpu.memory_space<vmem>>, vector<1x1x2x8xf32>
    %124 = vector.shape_cast %123 : vector<1x1x2x8xf32> to vector<2x8xf32>
    %125 = vector.shape_cast %122 : vector<2x8xf32> to vector<1x1x2x8xf32>
    tpu.vector_store %arg6[%c0_79, %c7_80, %c0_81, %c0_82], %125 {strides = array<i32>} : memref<1x12x2x8xf32, #tpu.memory_space<vmem>>, vector<1x1x2x8xf32>,
    %cst_83 = arith.constant 0.000000e+00 : f32
    %126 = vector.broadcast %cst_83 : f32 to vector<2x8x128xf32>
    %c0_i32_84 = arith.constant 0 : i32
    %c128_i32_85 = arith.constant 128 : i32
    %127 = arith.muli %c0_i32_84, %c128_i32_85 : i32
    %128 = tpu.assume_multiple %127, 128 : i32
    %c0_86 = arith.constant 0 : index
    %c0_87 = arith.constant 0 : index
    %129 = arith.index_cast %128 : i32 to index
    %130 = vector.load %arg4[%c0_86, %c0_87, %129] : memref<2x8x128xf32, #tpu.memory_space<vmem>>, vector<2x8x128xf32>
    %c0_88 = arith.constant 0 : index
    %c2_89 = arith.constant 2 : index
    %c0_90 = arith.constant 0 : index
    %131 = arith.index_cast %128 : i32 to index
    %132 = vector.load %arg5[%c0_88, %c2_89, %c0_90, %131] : memref<2x3x8x128xf32, #tpu.memory_space<vmem>>, vector<2x1x8x128xf32>
    %133 = vector.shape_cast %132 : vector<2x1x8x128xf32> to vector<2x8x128xf32>
    %134 = tpu.iota {dimensions = array<i32: 2>} : vector<1x1x128xi32>
    %135 = arith.addi %5, %128 : i32
    %136 = vector.broadcast %135 : i32 to vector<1x1x128xi32>
    %137 = arith.addi %134, %136 : vector<1x1x128xi32>
    %c64_i32_91 = arith.constant 64 : i32
    %138 = vector.broadcast %c64_i32_91 : i32 to vector<1x1x128xi32>
    %139 = arith.cmpi slt, %137, %138 : vector<1x1x128xi32>
    %140 = arith.extui %139 : vector<1x1x128xi1> to vector<1x1x128xi32>
    %141 = arith.sitofp %140 : vector<1x1x128xi32> to vector<1x1x128xf32>
    %142 = vector.broadcast %141 : vector<1x1x128xf32> to vector<2x8x128xf32>
    %143 = arith.subf %142, %130 : vector<2x8x128xf32>
    %144 = vector.broadcast %141 : vector<1x1x128xf32> to vector<2x8x128xf32>
    %145 = arith.subf %144, %133 : vector<2x8x128xf32>
    %146 = arith.mulf %130, %133 : vector<2x8x128xf32>
    %147 = arith.addf %126, %146 : vector<2x8x128xf32>
    %148 = arith.mulf %130, %130 : vector<2x8x128xf32>
    %149 = arith.mulf %133, %133 : vector<2x8x128xf32>
    %150 = arith.addf %148, %149 : vector<2x8x128xf32>
    %151 = arith.addf %126, %150 : vector<2x8x128xf32>
    %152 = arith.mulf %143, %145 : vector<2x8x128xf32>
    %153 = arith.addf %126, %152 : vector<2x8x128xf32>
    %154 = arith.mulf %143, %143 : vector<2x8x128xf32>
    %155 = arith.mulf %145, %145 : vector<2x8x128xf32>
    %156 = arith.addf %154, %155 : vector<2x8x128xf32>
    %157 = arith.addf %126, %156 : vector<2x8x128xf32>
    %c1_i32_92 = arith.constant 1 : i32
    %c0_93 = arith.constant 0 : index
    %c8 = arith.constant 8 : index
    %c0_94 = arith.constant 0 : index
    %c0_95 = arith.constant 0 : index
    %158 = vector.load %arg6[%c0_93, %c8, %c0_94, %c0_95] : memref<1x12x2x8xf32, #tpu.memory_space<vmem>>, vector<1x1x2x8xf32>
    %159 = vector.shape_cast %158 : vector<1x1x2x8xf32> to vector<2x8xf32>
    %cst_96 = arith.constant dense<0.000000e+00> : vector<2x8xf32>
    %160 = vector.multi_reduction <add>, %147, %cst_96 [2] : vector<2x8x128xf32> to vector<2x8xf32>
    %161 = arith.addf %159, %160 : vector<2x8xf32>
    %c0_97 = arith.constant 0 : index
    %c8_98 = arith.constant 8 : index
    %c0_99 = arith.constant 0 : index
    %c0_100 = arith.constant 0 : index
    %162 = vector.load %arg6[%c0_97, %c8_98, %c0_99, %c0_100] : memref<1x12x2x8xf32, #tpu.memory_space<vmem>>, vector<1x1x2x8xf32>
    %163 = vector.shape_cast %162 : vector<1x1x2x8xf32> to vector<2x8xf32>
    %164 = vector.shape_cast %161 : vector<2x8xf32> to vector<1x1x2x8xf32>
    tpu.vector_store %arg6[%c0_97, %c8_98, %c0_99, %c0_100], %164 {strides = array<i32>} : memref<1x12x2x8xf32, #tpu.memory_space<vmem>>, vector<1x1x2x8xf32>,
    %c0_101 = arith.constant 0 : index
    %c9 = arith.constant 9 : index
    %c0_102 = arith.constant 0 : index
    %c0_103 = arith.constant 0 : index
    %165 = vector.load %arg6[%c0_101, %c9, %c0_102, %c0_103] : memref<1x12x2x8xf32, #tpu.memory_space<vmem>>, vector<1x1x2x8xf32>
    %166 = vector.shape_cast %165 : vector<1x1x2x8xf32> to vector<2x8xf32>
    %cst_104 = arith.constant dense<0.000000e+00> : vector<2x8xf32>
    %167 = vector.multi_reduction <add>, %151, %cst_104 [2] : vector<2x8x128xf32> to vector<2x8xf32>
    %168 = arith.addf %166, %167 : vector<2x8xf32>
    %c0_105 = arith.constant 0 : index
    %c9_106 = arith.constant 9 : index
    %c0_107 = arith.constant 0 : index
    %c0_108 = arith.constant 0 : index
    %169 = vector.load %arg6[%c0_105, %c9_106, %c0_107, %c0_108] : memref<1x12x2x8xf32, #tpu.memory_space<vmem>>, vector<1x1x2x8xf32>
    %170 = vector.shape_cast %169 : vector<1x1x2x8xf32> to vector<2x8xf32>
    %171 = vector.shape_cast %168 : vector<2x8xf32> to vector<1x1x2x8xf32>
    tpu.vector_store %arg6[%c0_105, %c9_106, %c0_107, %c0_108], %171 {strides = array<i32>} : memref<1x12x2x8xf32, #tpu.memory_space<vmem>>, vector<1x1x2x8xf32>,
    %c0_109 = arith.constant 0 : index
    %c10 = arith.constant 10 : index
    %c0_110 = arith.constant 0 : index
    %c0_111 = arith.constant 0 : index
    %172 = vector.load %arg6[%c0_109, %c10, %c0_110, %c0_111] : memref<1x12x2x8xf32, #tpu.memory_space<vmem>>, vector<1x1x2x8xf32>
    %173 = vector.shape_cast %172 : vector<1x1x2x8xf32> to vector<2x8xf32>
    %cst_112 = arith.constant dense<0.000000e+00> : vector<2x8xf32>
    %174 = vector.multi_reduction <add>, %153, %cst_112 [2] : vector<2x8x128xf32> to vector<2x8xf32>
    %175 = arith.addf %173, %174 : vector<2x8xf32>
    %c0_113 = arith.constant 0 : index
    %c10_114 = arith.constant 10 : index
    %c0_115 = arith.constant 0 : index
    %c0_116 = arith.constant 0 : index
    %176 = vector.load %arg6[%c0_113, %c10_114, %c0_115, %c0_116] : memref<1x12x2x8xf32, #tpu.memory_space<vmem>>, vector<1x1x2x8xf32>
    %177 = vector.shape_cast %176 : vector<1x1x2x8xf32> to vector<2x8xf32>
    %178 = vector.shape_cast %175 : vector<2x8xf32> to vector<1x1x2x8xf32>
    tpu.vector_store %arg6[%c0_113, %c10_114, %c0_115, %c0_116], %178 {strides = array<i32>} : memref<1x12x2x8xf32, #tpu.memory_space<vmem>>, vector<1x1x2x8xf32>,
    %c0_117 = arith.constant 0 : index
    %c11 = arith.constant 11 : index
    %c0_118 = arith.constant 0 : index
    %c0_119 = arith.constant 0 : index
    %179 = vector.load %arg6[%c0_117, %c11, %c0_118, %c0_119] : memref<1x12x2x8xf32, #tpu.memory_space<vmem>>, vector<1x1x2x8xf32>
    %180 = vector.shape_cast %179 : vector<1x1x2x8xf32> to vector<2x8xf32>
    %cst_120 = arith.constant dense<0.000000e+00> : vector<2x8xf32>
    %181 = vector.multi_reduction <add>, %157, %cst_120 [2] : vector<2x8x128xf32> to vector<2x8xf32>
    %182 = arith.addf %180, %181 : vector<2x8xf32>
    %c0_121 = arith.constant 0 : index
    %c11_122 = arith.constant 11 : index
    %c0_123 = arith.constant 0 : index
    %c0_124 = arith.constant 0 : index
    %183 = vector.load %arg6[%c0_121, %c11_122, %c0_123, %c0_124] : memref<1x12x2x8xf32, #tpu.memory_space<vmem>>, vector<1x1x2x8xf32>
    %184 = vector.shape_cast %183 : vector<1x1x2x8xf32> to vector<2x8xf32>
    %185 = vector.shape_cast %182 : vector<2x8xf32> to vector<1x1x2x8xf32>
    tpu.vector_store %arg6[%c0_121, %c11_122, %c0_123, %c0_124], %185 {strides = array<i32>} : memref<1x12x2x8xf32, #tpu.memory_space<vmem>>, vector<1x1x2x8xf32>,
    return
  }
  func.func @transform_0(%arg0: i32, %arg1: i32) -> (i32, i32, i32) {
    %c1_i32 = arith.constant 1 : i32
    %0 = arith.muli %arg0, %c1_i32 : i32
    %1 = arith.addi %0, %arg1 : i32
    %c0_i32 = arith.constant 0 : i32
    %c0_i32_0 = arith.constant 0 : i32
    %c0_i32_1 = arith.constant 0 : i32
    return %c0_i32, %c0_i32_0, %1 : i32, i32, i32
  }
  func.func @transform_1(%arg0: i32, %arg1: i32) -> (i32, i32, i32) {
    %c1_i32 = arith.constant 1 : i32
    %0 = arith.muli %arg0, %c1_i32 : i32
    %1 = arith.addi %0, %arg1 : i32
    %c0_i32 = arith.constant 0 : i32
    %c0_i32_0 = arith.constant 0 : i32
    %c0_i32_1 = arith.constant 0 : i32
    return %c0_i32, %c0_i32_0, %1 : i32, i32, i32
  }
  func.func @transform_2(%arg0: i32, %arg1: i32) -> (i32, i32, i32) {
    %c1_i32 = arith.constant 1 : i32
    %0 = arith.muli %arg0, %c1_i32 : i32
    %1 = arith.addi %0, %arg1 : i32
    %c0_i32 = arith.constant 0 : i32
    %c0_i32_0 = arith.constant 0 : i32
    %c0_i32_1 = arith.constant 0 : i32
    return %c0_i32, %c0_i32_0, %1 : i32, i32, i32
  }
  func.func @transform_3(%arg0: i32, %arg1: i32) -> (i32, i32, i32, i32) {
    %c1_i32 = arith.constant 1 : i32
    %0 = arith.muli %arg0, %c1_i32 : i32
    %1 = arith.addi %0, %arg1 : i32
    %c0_i32 = arith.constant 0 : i32
    %c0_i32_0 = arith.constant 0 : i32
    %c0_i32_1 = arith.constant 0 : i32
    %c0_i32_2 = arith.constant 0 : i32
    return %c0_i32, %c0_i32_0, %c0_i32_1, %1 : i32, i32, i32, i32
  }
  func.func @transform_4(%arg0: i32, %arg1: i32) -> (i32, i32, i32, i32) {
    %c0_i32 = arith.constant 0 : i32
    %c0_i32_0 = arith.constant 0 : i32
    %c0_i32_1 = arith.constant 0 : i32
    %c0_i32_2 = arith.constant 0 : i32
    return %arg0, %c0_i32, %c0_i32_0, %c0_i32_1 : i32, i32, i32, i32
  }
}

</mosaic_0001>

<bundles_post_ra>
// kernel: tpu_custom_call.1
= control target key start
LH: loop header
LB: loop body
LE: loop exit
PB: predicated region body
PF: predicated region fallthrough
CT: control target
= control target key end

     0   :  { %9 = vsyncpa [#allocation3], 0  ;;  %s821_s0 = inlined_call_operand.hbm [shape: f32[2,8,128], index: 0, kind: input, shape index: {}]   ;;  %s822_s1 = inlined_call_operand.hbm [shape: f32[2,8,128], index: 1, kind: input, shape index: {}]   ;;  %s823_s2 = inlined_call_operand.hbm [shape: f32[2,8,128], index: 2, kind: input, shape index: {}]   ;;  %s824_s3 = inlined_call_operand.hbm [shape: f32[2,3,8,128], index: 3, kind: input, shape index: {}]   ;;  %s825_s4 = inlined_call_operand.vmem [shape: f32[1,12,2,8], index: 4, kind: output, shape index: {}]  }
   0x1   :  { %10 = vsyncpa [#allocation5], 0 }
   0x2   :  { %11 = vsyncpa [#allocation8], 0  ;;  %s581_s15 = smov [#allocation4]   ;;  %s582_s17 = smov [#allocation2]  }
   0x3   :  { %s35_s16 = sshll.u32 %s581_s15, 4  ;;  %s20_s18 = sshll.u32 %s582_s17, 4  ;;  %s36_s16 = int_to_ptr.vmem [resolvable:$true] %s35_s16  ;;  %s21_s18 = int_to_ptr.vmem [resolvable:$true] %s20_s18 }
   0x4   :  { %s503_s19 = scalar_lea.vmem %s36_s16, 256  ;;  %p508_p1 = scmp.lt.s32.totalorder %s36_s16, %s36_s16 }
   0x5   :  { %p504_p0 = scmp.ne.s32.totalorder %s36_s16, %s503_s19  ;;  %p509_p2 = scmp.lt.s32.totalorder %s503_s19, %s503_s19 }
   0x7   :  { %p510_p3 = por %p509_p2, %p508_p1 }
   0x9   :  { %p511_p4 = pnand %p510_p3, %p504_p0 }
   0xb   :  { %514 = shalt.err (!%p511_p4)
}
   0xc   :  { %s583_s20 = smov 128   ;;  %s584_s21 = smov 8  }
   0xd   :  { %41 = dma.hbm_to_vmem [thread:$0]  %s822_s1, 256, %s36_s16, [#allocation5], %s583_s20, %s583_s20, %s584_s21  }
   0xe   :  { %s523_s24 = scalar_lea.vmem %s21_s18, 256  ;;  %p528_p6 = scmp.lt.s32.totalorder %s21_s18, %s21_s18 }
   0xf   :  { %p524_p5 = scmp.ne.s32.totalorder %s21_s18, %s523_s24  ;;  %p529_p7 = scmp.lt.s32.totalorder %s523_s24, %s523_s24 }
  0x11   :  { %p530_p8 = por %p529_p7, %p528_p6 }
  0x13   :  { %p531_p9 = pnand %p530_p8, %p524_p5 }
  0x15   :  { %534 = shalt.err (!%p531_p9)
}
  0x16   :  { %26 = dma.hbm_to_vmem [thread:$0]  %s821_s0, 256, %s21_s18, [#allocation3], %s583_s20, %s583_s20, %s584_s21  }
  0x17   :  { %s585_s27 = smov [#allocation6]   ;;  %s586_s29 = smov [#allocation7]  }
  0x18   :  { %s50_s28 = sshll.u32 %s585_s27, 4  ;;  %s65_s30 = sshll.u32 %s586_s29, 4  ;;  %s51_s28 = int_to_ptr.vmem [resolvable:$true] %s50_s28  ;;  %s66_s30 = int_to_ptr.vmem [resolvable:$true] %s65_s30 }
  0x19   :  { %s543_s1 = scalar_lea.vmem %s51_s28, 256  ;;  %p548_p11 = scmp.lt.s32.totalorder %s51_s28, %s51_s28 }
  0x1a   :  { %p544_p10 = scmp.ne.s32.totalorder %s51_s28, %s543_s1  ;;  %p549_p12 = scmp.lt.s32.totalorder %s543_s1, %s543_s1 }
  0x1c   :  { %p550_p13 = por %p549_p12, %p548_p11 }
  0x1e   :  { %p551_p0 = pnand %p550_p13, %p544_p10 }
  0x20   :  { %554 = shalt.err (!%p551_p0)
}
  0x21   :  { %56 = dma.hbm_to_vmem [thread:$0]  %s823_s2, 256, %s51_s28, [#allocation5], %s583_s20, %s583_s20, %s584_s21  }
  0x22   :  { %s563_s0 = scalar_lea.vmem %s66_s30, 768  ;;  %p568_p2 = scmp.lt.s32.totalorder %s66_s30, %s66_s30 }
  0x23   :  { %p564_p1 = scmp.ne.s32.totalorder %s66_s30, %s563_s0  ;;  %p569_p3 = scmp.lt.s32.totalorder %s563_s0, %s563_s0 }
  0x25   :  { %p570_p4 = por %p569_p3, %p568_p2 }
  0x27   :  { %p571_p5 = pnand %p570_p4, %p564_p1 }
  0x29   :  { %574 = shalt.err (!%p571_p5)
}
  0x2a   :  { %71 = dma.hbm_to_vmem [thread:$0]  %s824_s3, 768, %s66_s30, [#allocation8], %s583_s20, %s583_s20, %s584_s21  }
  0x2b   :  { %575 = dma.done.wait [#allocation3], 256  }
  0x2c   :  { %576 = vsyncadd [#allocation3], 4294967040 }
  0x2d   :  { %577 = dma.done.wait [#allocation5], 512  }
  0x2e   :  { %578 = vsyncadd [#allocation5], 4294966784 }
  0x2f   :  { %579 = dma.done.wait [#allocation8], 768  }
  0x30   :  { %580 = vsyncadd [#allocation8], 4294966528  ;;  %v111_v0 = vlaneseq  ;;  %v107_v4 = vld [vmem:[#allocation2] sm:$0xff]  ;;  %v109_v5 = vld [vmem:[#allocation7] sm:$0xff]  ;;  %v587_v7 = vmov 0.0   ;;  %vm92_vm1 = vcmask 58368  }
  0x31   :  { %v108_v6 = vld [vmem:[#allocation2 + $0x8] sm:$0xff]  ;;  %v123_v9 = vmul.f32 %v109_v5, %v107_v4  ;;  %v127_v10 = vmul.f32 %v107_v4, %v107_v4  ;;  %v129_v11 = vmul.f32 %v109_v5, %v109_v5  ;;  %v228_v29 = vld [vmem:[#allocation4] sm:$0xff]  ;;  %v232_v30 = vld [vmem:[#allocation7 + $0x8] sm:$0xff]  ;;  %93 = vst.msk [vmem:[%s825_s4] sm:$0x3] %vm92_vm1, %v587_v7  ;;  %vm162_vm2 = vcmask 1041409  }
  0x32   :  { %v112_v1 = vand.u32 127, %v111_v0  ;;  %v155_v2 = vshrl.u32 %v111_v0, 7  ;;  %v110_v12 = vld [vmem:[#allocation7 + $0x18] sm:$0xff]  ;;  %v128_v13 = vmul.f32 %v108_v6, %v108_v6  ;;  %v229_v32 = vld [vmem:[#allocation4 + $0x8] sm:$0xff]  ;;  %v233_v33 = vld [vmem:[#allocation7 + $0x20] sm:$0xff]  ;;  %v238_v34 = vmul.f32 %v232_v30, %v228_v29 }
  0x33   :  { %v130_v14 = vmul.f32 %v110_v12, %v110_v12  ;;  %148 = vadd.xlane.f32.xlu0 %v123_v9  ;;  %v131_v15 = vadd.f32 %v129_v11, %v127_v10  ;;  %v124_v16 = vmul.f32 %v110_v12, %v108_v6  ;;  %94 = vst.msk [vmem:[%s825_s4 + $0x2] sm:$0x3] %vm92_vm1, %v587_v7  ;;  %95 = vst.msk [vmem:[%s825_s4 + $0x4] sm:$0x3] %vm92_vm1, %v587_v7  ;;  %v342_v53 = vld [vmem:[#allocation6] sm:$0xff]  ;;  %v343_v56 = vld [vmem:[#allocation6 + $0x8] sm:$0xff] }
  0x34   :  { %vm116_vm0 = vcmp.lt.s32.totalorder %v112_v1, 64  ;;  %v637_v3 = vsub.s32 %v112_v1, %v155_v2  ;;  %96 = vst.msk [vmem:[%s825_s4 + $0x6] sm:$0x3] %vm92_vm1, %v587_v7  ;;  %97 = vst.msk [vmem:[%s825_s4 + $0x8] sm:$0x3] %vm92_vm1, %v587_v7  ;;  %v242_v35 = vmul.f32 %v228_v29, %v228_v29  ;;  %v244_v36 = vmul.f32 %v232_v30, %v232_v30  ;;  %v346_v54 = vld [vmem:[#allocation7 + $0x10] sm:$0xff] }
  0x35   :  { %v639_v8 = vsel %vm116_vm0, 1.0, %v587_v7  ;;  %170 = vadd.xlane.f32.xlu1 %v131_v15  ;;  %v132_v19 = vadd.f32 %v130_v14, %v128_v13  ;;  %98 = vst.msk [vmem:[%s825_s4 + $0xa] sm:$0x3] %vm92_vm1, %v587_v7  ;;  %99 = vst.msk [vmem:[%s825_s4 + $0xc] sm:$0x3] %vm92_vm1, %v587_v7  ;;  %v239_v37 = vmul.f32 %v233_v33, %v229_v32  ;;  %v347_v57 = vld [vmem:[#allocation7 + $0x28] sm:$0xff] }
  0x36   :  { %v119_v17 = vsub.f32 %v639_v8, %v107_v4  ;;  %v121_v18 = vsub.f32 %v639_v8, %v109_v5  ;;  %v120_v20 = vsub.f32 %v639_v8, %v108_v6  ;;  %v122_v21 = vsub.f32 %v639_v8, %v110_v12  ;;  %100 = vst.msk [vmem:[%s825_s4 + $0xe] sm:$0x3] %vm92_vm1, %v587_v7 }
  0x37   :  { %150 = vadd.xlane.f32.xlu0 %v124_v16  ;;  %101 = vst.msk [vmem:[%s825_s4 + $0x10] sm:$0x3] %vm92_vm1, %v587_v7  ;;  %102 = vst.msk [vmem:[%s825_s4 + $0x12] sm:$0x3] %vm92_vm1, %v587_v7  ;;  %v243_v38 = vmul.f32 %v229_v32, %v229_v32  ;;  %v245_v39 = vmul.f32 %v233_v33, %v233_v33  ;;  %v246_v40 = vadd.f32 %v244_v36, %v242_v35 }
  0x38   :  { %v135_v22 = vmul.f32 %v121_v18, %v119_v17  ;;  %v139_v23 = vmul.f32 %v119_v17, %v119_v17  ;;  %v141_v24 = vmul.f32 %v121_v18, %v121_v18  ;;  %v136_v25 = vmul.f32 %v122_v21, %v120_v20  ;;  %103 = vst.msk [vmem:[%s825_s4 + $0x14] sm:$0x3] %vm92_vm1, %v587_v7 }
  0x39   :  { %172 = vadd.xlane.f32.xlu1 %v132_v19  ;;  %v140_v26 = vmul.f32 %v120_v20, %v120_v20  ;;  %v142_v27 = vmul.f32 %v122_v21, %v122_v21  ;;  %104 = vst.msk [vmem:[%s825_s4 + $0x16] sm:$0x3] %vm92_vm1, %v587_v7  ;;  %v234_v41 = vsub.f32 %v639_v8, %v228_v29  ;;  %v147_v19 = vld [vmem:[%s825_s4] sm:$0x3] }
  0x3a   :  { %v143_v28 = vadd.f32 %v141_v24, %v139_v23  ;;  %v236_v42 = vsub.f32 %v639_v8, %v232_v30  ;;  %v247_v43 = vadd.f32 %v245_v39, %v243_v38  ;;  %v235_v44 = vsub.f32 %v639_v8, %v229_v32  ;;  %v466_v24 = vld [vmem:[%s825_s4 + $0x2] sm:$0x3] }
  0x3b   :  { %190 = vadd.xlane.f32.xlu0 %v135_v22  ;;  %v144_v31 = vadd.f32 %v142_v27, %v140_v26  ;;  %v237_v45 = vsub.f32 %v639_v8, %v233_v33  ;;  %v254_v47 = vmul.f32 %v234_v41, %v234_v41  ;;  %v352_v58 = vmul.f32 %v346_v54, %v342_v53  ;;  %v468_v33 = vld [vmem:[%s825_s4 + $0x4] sm:$0x3] }
  0x3c   :  { %v250_v46 = vmul.f32 %v236_v42, %v234_v41  ;;  %v256_v48 = vmul.f32 %v236_v42, %v236_v42  ;;  %v255_v50 = vmul.f32 %v235_v44, %v235_v44  ;;  %v356_v59 = vmul.f32 %v342_v53, %v342_v53 }
  0x3d   :  { %192 = vadd.xlane.f32.xlu1 %v136_v25  ;;  %v251_v49 = vmul.f32 %v237_v45, %v235_v44  ;;  %v257_v51 = vmul.f32 %v237_v45, %v237_v45  ;;  %v358_v60 = vmul.f32 %v346_v54, %v346_v54  ;;  %v353_v61 = vmul.f32 %v347_v57, %v343_v56 }
  0x3e   :  { %v258_v52 = vadd.f32 %v256_v48, %v254_v47  ;;  %v357_v62 = vmul.f32 %v343_v56, %v343_v56  ;;  %v359_v63 = vmul.f32 %v347_v57, %v347_v57  ;;  %v348_v1 = vsub.f32 %v639_v8, %v342_v53  ;;  %v472_v47 = vld [vmem:[%s825_s4 + $0x8] sm:$0x3] }
  0x3f   :  { %210 = vadd.xlane.f32.xlu0 %v143_v28  ;;  %v259_v55 = vadd.f32 %v257_v51, %v255_v50  ;;  %v360_v0 = vadd.f32 %v358_v60, %v356_v59  ;;  %v350_v2 = vsub.f32 %v639_v8, %v346_v54  ;;  %v349_v5 = vsub.f32 %v639_v8, %v343_v56  ;;  %v474_v54 = vld [vmem:[%s825_s4 + $0xa] sm:$0x3] }
  0x40   :  { %v361_v4 = vadd.f32 %v359_v63, %v357_v62  ;;  %v351_v6 = vsub.f32 %v639_v8, %v347_v57  ;;  %v368_v9 = vmul.f32 %v348_v1, %v348_v1 }
  0x41   :  { %212 = vadd.xlane.f32.xlu1 %v144_v31  ;;  %v364_v7 = vmul.f32 %v350_v2, %v348_v1  ;;  %v370_v10 = vmul.f32 %v350_v2, %v350_v2  ;;  %v369_v12 = vmul.f32 %v349_v5, %v349_v5 }
  0x42   :  { %v365_v11 = vmul.f32 %v351_v6, %v349_v5  ;;  %v371_v13 = vmul.f32 %v351_v6, %v351_v6  ;;  %v478_v5 = vld [vmem:[%s825_s4 + $0xe] sm:$0x3] }
  0x43   :  { %264 = vadd.xlane.f32.xlu0 %v238_v34  ;;  %v372_v14 = vadd.f32 %v370_v10, %v368_v9 }
  0x44   :  { %v373_v15 = vadd.f32 %v371_v13, %v369_v12  ;;  %v480_v13 = vld [vmem:[%s825_s4 + $0x10] sm:$0x3] }
  0x45   :  { %266 = vadd.xlane.f32.xlu1 %v239_v37 }
  0x47   :  { %284 = vadd.xlane.f32.xlu0 %v246_v40  ;;  %v470_v40 = vld [vmem:[%s825_s4 + $0x6] sm:$0x3] }
  0x49   :  { %286 = vadd.xlane.f32.xlu1 %v247_v43 }
  0x4b   :  { %304 = vadd.xlane.f32.xlu0 %v250_v46 }
  0x4d   :  { %306 = vadd.xlane.f32.xlu1 %v251_v49 }
  0x4f   :  { %324 = vadd.xlane.f32.xlu0 %v258_v52 }
  0x51   :  { %326 = vadd.xlane.f32.xlu1 %v259_v55 }
  0x53   :  { %378 = vadd.xlane.f32.xlu0 %v352_v58 }
  0x55   :  { %380 = vadd.xlane.f32.xlu1 %v353_v61  ;;  %v476_v61 = vld [vmem:[%s825_s4 + $0xc] sm:$0x3] }
  0x57   :  { %398 = vadd.xlane.f32.xlu0 %v360_v0 }
  0x59   :  { %400 = vadd.xlane.f32.xlu1 %v361_v4 }
  0x5b   :  { %418 = vadd.xlane.f32.xlu0 %v364_v7 }
  0x5d   :  { %420 = vadd.xlane.f32.xlu1 %v365_v11 }
  0x5f   :  { %438 = vadd.xlane.f32.xlu0 %v372_v14 }
  0x61   :  { %440 = vadd.xlane.f32.xlu1 %v373_v15 }
  0xbc   :  { %v149_v16 = vpop.xlane.xlu0 %148 }
  0xbd   :  { %v157_v8 = vrot.slane %v149_v16, %v637_v3 }
  0xbe   :  { %v171_v17 = vpop.xlane.xlu1 %170 }
  0xbf   :  { %v179_v22 = vrot.slane %v171_v17, %v637_v3 }
  0xc0   :  { %v151_v18 = vpop.xlane.xlu0 %150 }
  0xc1   :  { %v161_v20 = vrot.slane %v151_v18, %v637_v3 }
  0xc2   :  { %v173_v21 = vpop.xlane.xlu1 %172 }
  0xc3   :  { %v163_v23 = vsel %vm162_vm2, %v161_v20, %v157_v8  ;;  %v183_v25 = vrot.slane %v173_v21, %v637_v3 }
  0xc4   :  { %v165_v26 = vadd.f32 %v163_v23, %v147_v19  ;;  %v191_v27 = vpop.xlane.xlu0 %190  ;;  %v482_v19 = vld [vmem:[%s825_s4 + $0x12] sm:$0x3] }
  0xc5   :  { %v184_v28 = vsel %vm162_vm2, %v183_v25, %v179_v22  ;;  %v199_v29 = vrot.slane %v191_v27, %v637_v3 }
  0xc6   :  { %167 = vst.msk [vmem:[%s825_s4] sm:$0x3] %vm92_vm1, %v165_v26  ;;  %v186_v30 = vadd.f32 %v466_v24, %v184_v28  ;;  %v193_v31 = vpop.xlane.xlu1 %192  ;;  %v484_v26 = vld [vmem:[%s825_s4 + $0x14] sm:$0x3] }
  0xc7   :  { %v203_v32 = vrot.slane %v193_v31, %v637_v3 }
  0xc8   :  { %467 = vst.msk [vmem:[%s825_s4 + $0x2] sm:$0x3] %vm92_vm1, %v186_v30  ;;  %v211_v34 = vpop.xlane.xlu0 %210 }
  0xc9   :  { %v204_v35 = vsel %vm162_vm2, %v203_v32, %v199_v29  ;;  %v219_v36 = vrot.slane %v211_v34, %v637_v3 }
  0xca   :  { %v206_v37 = vadd.f32 %v468_v33, %v204_v35  ;;  %v213_v38 = vpop.xlane.xlu1 %212  ;;  %v486_v33 = vld [vmem:[%s825_s4 + $0x16] sm:$0x3] }
  0xcb   :  { %v223_v39 = vrot.slane %v213_v38, %v637_v3 }
  0xcc   :  { %469 = vst.msk [vmem:[%s825_s4 + $0x4] sm:$0x3] %vm92_vm1, %v206_v37  ;;  %v265_v41 = vpop.xlane.xlu0 %264 }
  0xcd   :  { %v224_v42 = vsel %vm162_vm2, %v223_v39, %v219_v36  ;;  %v273_v43 = vrot.slane %v265_v41, %v637_v3 }
  0xce   :  { %v226_v44 = vadd.f32 %v470_v40, %v224_v42  ;;  %v267_v45 = vpop.xlane.xlu1 %266 }
  0xcf   :  { %v277_v46 = vrot.slane %v267_v45, %v637_v3 }
  0xd0   :  { %471 = vst.msk [vmem:[%s825_s4 + $0x6] sm:$0x3] %vm92_vm1, %v226_v44  ;;  %v285_v48 = vpop.xlane.xlu0 %284 }
  0xd1   :  { %v278_v49 = vsel %vm162_vm2, %v277_v46, %v273_v43  ;;  %v293_v50 = vrot.slane %v285_v48, %v637_v3 }
  0xd2   :  { %v280_v51 = vadd.f32 %v472_v47, %v278_v49  ;;  %v287_v52 = vpop.xlane.xlu1 %286 }
  0xd3   :  { %v297_v53 = vrot.slane %v287_v52, %v637_v3 }
  0xd4   :  { %473 = vst.msk [vmem:[%s825_s4 + $0x8] sm:$0x3] %vm92_vm1, %v280_v51  ;;  %v305_v55 = vpop.xlane.xlu0 %304 }
  0xd5   :  { %v298_v56 = vsel %vm162_vm2, %v297_v53, %v293_v50  ;;  %v313_v57 = vrot.slane %v305_v55, %v637_v3 }
  0xd6   :  { %v300_v58 = vadd.f32 %v474_v54, %v298_v56  ;;  %v307_v59 = vpop.xlane.xlu1 %306 }
  0xd7   :  { %v317_v60 = vrot.slane %v307_v59, %v637_v3 }
  0xd8   :  { %475 = vst.msk [vmem:[%s825_s4 + $0xa] sm:$0x3] %vm92_vm1, %v300_v58  ;;  %v325_v62 = vpop.xlane.xlu0 %324 }
  0xd9   :  { %v318_v63 = vsel %vm162_vm2, %v317_v60, %v313_v57  ;;  %v333_v0 = vrot.slane %v325_v62, %v637_v3 }
  0xda   :  { %v320_v1 = vadd.f32 %v476_v61, %v318_v63  ;;  %v327_v2 = vpop.xlane.xlu1 %326 }
  0xdb   :  { %v337_v4 = vrot.slane %v327_v2, %v637_v3 }
  0xdc   :  { %477 = vst.msk [vmem:[%s825_s4 + $0xc] sm:$0x3] %vm92_vm1, %v320_v1  ;;  %v379_v6 = vpop.xlane.xlu0 %378 }
  0xdd   :  { %v338_v7 = vsel %vm162_vm2, %v337_v4, %v333_v0  ;;  %v387_v9 = vrot.slane %v379_v6, %v637_v3 }
  0xde   :  { %v340_v10 = vadd.f32 %v478_v5, %v338_v7  ;;  %v381_v11 = vpop.xlane.xlu1 %380 }
  0xdf   :  { %v391_v12 = vrot.slane %v381_v11, %v637_v3 }
  0xe0   :  { %479 = vst.msk [vmem:[%s825_s4 + $0xe] sm:$0x3] %vm92_vm1, %v340_v10  ;;  %v399_v14 = vpop.xlane.xlu0 %398 }
  0xe1   :  { %v392_v15 = vsel %vm162_vm2, %v391_v12, %v387_v9  ;;  %v407_v16 = vrot.slane %v399_v14, %v637_v3 }
  0xe2   :  { %v394_v17 = vadd.f32 %v480_v13, %v392_v15  ;;  %v401_v18 = vpop.xlane.xlu1 %400 }
  0xe3   :  { %v411_v8 = vrot.slane %v401_v18, %v637_v3 }
  0xe4   :  { %481 = vst.msk [vmem:[%s825_s4 + $0x10] sm:$0x3] %vm92_vm1, %v394_v17  ;;  %v419_v20 = vpop.xlane.xlu0 %418 }
  0xe5   :  { %v412_v21 = vsel %vm162_vm2, %v411_v8, %v407_v16  ;;  %v427_v22 = vrot.slane %v419_v20, %v637_v3 }
  0xe6   :  { %v414_v23 = vadd.f32 %v482_v19, %v412_v21  ;;  %v421_v24 = vpop.xlane.xlu1 %420 }
  0xe7   :  { %v431_v25 = vrot.slane %v421_v24, %v637_v3 }
  0xe8   :  { %483 = vst.msk [vmem:[%s825_s4 + $0x12] sm:$0x3] %vm92_vm1, %v414_v23  ;;  %v439_v27 = vpop.xlane.xlu0 %438 }
  0xe9   :  { %v432_v28 = vsel %vm162_vm2, %v431_v25, %v427_v22  ;;  %v447_v29 = vrot.slane %v439_v27, %v637_v3 }
  0xea   :  { %v434_v30 = vadd.f32 %v484_v26, %v432_v28  ;;  %v441_v31 = vpop.xlane.xlu1 %440 }
  0xeb   :  { %v451_v32 = vrot.slane %v441_v31, %v637_v3 }
  0xec   :  { %485 = vst.msk [vmem:[%s825_s4 + $0x14] sm:$0x3] %vm92_vm1, %v434_v30 }
  0xed   :  { %v452_v34 = vsel %vm162_vm2, %v451_v32, %v447_v29 }
  0xee   :  { %v454_v35 = vadd.f32 %v486_v33, %v452_v34 }
  0xf0   :  { %487 = vst.msk [vmem:[%s825_s4 + $0x16] sm:$0x3] %vm92_vm1, %v454_v35 }
  0xf1   :  { %460 = vsyncpa [#allocation3], 1 }
  0xf2   :  { %461 = vsyncpa [#allocation5], 1 }
  0xf3   :  { %462 = vsyncpa [#allocation8], 1 }

</bundles_post_ra>
